<compile_context>
chip_gen: v6e
topology: v6e:2x2x1
jax: 0.10.0
libtpu: 0.0.40
codegen_flags: <defaults>
</compile_context>

<pallas_src>
import math

import jax
import jax.numpy as jnp
from jax.experimental import pallas as pl
from jax.experimental.pallas import tpu as pltpu


def _sigmoid_kernel(x_ref, p_ref, o_ref):
    # y = 0.5 * tanh(a*x - b) + c   (algebraically exact sigmoid + bias)
    x = x_ref[...].astype(jnp.float32)      # (tr, tl)
    p = p_ref[...]                          # (3, tl) f32, broadcast over rows
    a = p[0:1, :]
    b = p[1:2, :]
    c = p[2:3, :]
    y = 0.5 * jnp.tanh(a * x - b) + c
    o_ref[...] = y.astype(o_ref.dtype)


def _round_up(x, m):
    return ((x + m - 1) // m) * m


def _round_down(x, m):
    return (x // m) * m


def _pick_lane_tile(L, cap):
    """L is a multiple of 128 by construction; pick a lane tile <= cap."""
    if L <= cap:
        return L
    t = _round_down(cap, 128)
    while t >= 128:
        if L % t == 0:
            return t
        t -= 128
    return 128  # always divides (L % 128 == 0)


def _tile_budget_bytes():
    """Per-tile byte budget (4 buffers live: double-buffered X in + Y out)."""
    try:
        info = pltpu.get_tpu_info()
        vmem = getattr(info, "vmem_capacity_bytes", 128 << 20)
        if vmem <= (64 << 20):
            # v7x: HBM ~3.2 TB/s so per-step overhead matters more, but only
            # 64 MiB physical VMEM -> cap at 6 MiB tiles (24 MiB live).
            return 6 << 20
    except Exception:
        pass
    # v5e/v6e (128 MiB VMEM): 4 MiB tiles already sit at ~86% of HBM roofline.
    return 4 << 20


def sigmoid_forward(x, slope, shift, bias=None, *, target_lanes=1024,
                    max_lane_tile=2048, min_grid_steps=4):
    """y = 1 / (1 + exp(-slope * (x - shift))) + bias.

    x: (B, F) float32 or bfloat16.  slope, shift: (1, F).  bias: (F,) or None.
    """
    B, F = x.shape
    out_dtype = x.dtype
    itemsize = jnp.dtype(out_dtype).itemsize
    sublane = {4: 8, 2: 16, 1: 32}.get(itemsize, 8)

    # ---- Pre-fold per-feature algebra (tiny wrapper-side cost; X untouched).
    slope_f = jnp.asarray(slope, jnp.float32).reshape(1, F)
    shift_f = jnp.asarray(shift, jnp.float32).reshape(1, F)
    bias_f = (jnp.zeros((1, F), jnp.float32) if bias is None
              else jnp.asarray(bias, jnp.float32).reshape(1, F))
    a = 0.5 * slope_f
    b = a * shift_f
    c = 0.5 + bias_f
    params = jnp.concatenate([a, b, c], axis=0)        # (3, F) f32

    # ---- Lane densification.  Row-major (B, F) == (B/reps, F*reps) with params
    # tiled `reps` times.  Prefer repacking; fall back to padding F to a
    # multiple of 128 (pads sliced off after) so stores stay full-lane.
    r0 = 128 // math.gcd(F, 128)             # smallest reps making F*reps % 128 == 0
    if B % r0 == 0:
        F_eff, pad_f, reps = F, 0, r0
        x2 = x
    else:
        F_eff = _round_up(F, 128)
        pad_f = F_eff - F
        reps = 1
        x2 = jnp.pad(x, ((0, 0), (0, pad_f)))
        params = jnp.pad(params, ((0, 0), (0, pad_f)))
    # Widen toward target_lanes even when F is already a multiple of 128.
    while B % (reps * 2) == 0 and F_eff * reps * 2 <= target_lanes:
        reps *= 2
    R, L = B // reps, F_eff * reps
    x2 = x2.reshape(R, L)
    if reps > 1:
        params = jnp.tile(params, (1, reps))           # (3, L)

    # ---- Tile / grid selection (fixed tiles, ragged last blocks via cdiv).
    tl = _pick_lane_tile(L, max_lane_tile)
    lane_blocks = pl.cdiv(L, tl)
    budget = _tile_budget_bytes()
    if R <= sublane:
        tr = R                                          # full (tiny) row dim
    else:
        budget_rows = max(sublane, budget // (tl * itemsize))
        tr = R if budget_rows >= R else max(sublane, _round_down(budget_rows, sublane))
    # Guarantee enough grid steps to pipeline DMAs and feed both v7x cores.
    while pl.cdiv(R, tr) * lane_blocks < min_grid_steps and tr > sublane:
        new_tr = max(sublane, _round_down(tr // 2, sublane))
        if new_tr == tr:
            break
        tr = new_tr
    grid = (pl.cdiv(R, tr), lane_blocks)

    out = pl.pallas_call(
        _sigmoid_kernel,
        out_shape=jax.ShapeDtypeStruct((R, L), out_dtype),
        grid_spec=pltpu.PrefetchScalarGridSpec(
            num_scalar_prefetch=0,
            grid=grid,
            in_specs=[
                pl.BlockSpec((tr, tl), lambda i, j: (i, j)),   # X tile
                pl.BlockSpec((3, tl), lambda i, j: (0, j)),    # stacked a/b/c
            ],
            out_specs=pl.BlockSpec((tr, tl), lambda i, j: (i, j)),
        ),
        compiler_params=pltpu.CompilerParams(
            # Pure elementwise: both grid axes independent (megacore-shardable).
            dimension_semantics=("parallel", "parallel"),
            # Double-buffered in + out at <=6 MiB tiles stays well under 32 MiB,
            # which itself is safe on every generation (v7x: 64 MiB physical).
            vmem_limit_bytes=32 << 20,
        ),
    )(x2, params)

    out = out.reshape(B, F_eff)
    if pad_f:
        out = out[:, :F]
    return out


def _reference(x, slope, shift, bias):
    x = x.astype(jnp.float32)
    return 1.0 / (1.0 + jnp.exp(-slope * (x - shift))) + bias.reshape(1, -1)


if __name__ == "__main__":
    key = jax.random.PRNGKey(0)
    keys = jax.random.split(key, 10)

    def make_params(k1, k2, f):
        slope = jax.random.normal(k1, (1, f), jnp.float32) * (1.0 / f)   # N(0, 1/F)
        shift = jax.random.uniform(k2, (1, f), jnp.float32, minval=-1.0, maxval=1.0)
        bias = jnp.zeros((f,), jnp.float32)
        return slope, shift, bias

    # --- 1) Small shape matching the module spec (repack path: F=32 -> L=256).
    B, F = 8, 32
    slope, shift, bias = make_params(keys[0], keys[1], F)
    x = jax.random.normal(keys[2], (B, F), jnp.float32)
    y = jax.block_until_ready(sigmoid_forward(x, slope, shift, bias))
    assert y.shape == (B, F)
    assert jnp.allclose(y, _reference(x, slope, shift, bias), atol=1e-5, rtol=1e-5)

    # --- 2) Multi-step 2-D grid; lane widening applied even though F % 128 == 0.
    B2, F2 = 2048, 256
    slope2, shift2, bias2 = make_params(keys[3], keys[4], F2)
    x2 = jax.random.normal(keys[5], (B2, F2), jnp.float32)
    y2 = jax.block_until_ready(sigmoid_forward(x2, slope2, shift2, bias2))
    assert jnp.allclose(y2, _reference(x2, slope2, shift2, bias2), atol=1e-5, rtol=1e-5)

    # --- 3) Awkward shape: F % 128 != 0 and B not foldable -> pad-to-128 path
    #         plus a ragged last row block.
    B3, F3 = 9, 200
    slope3, shift3, bias3 = make_params(keys[6], keys[7], F3)
    x3 = jax.random.normal(keys[8], (B3, F3), jnp.float32)
    y3 = jax.block_until_ready(sigmoid_forward(x3, slope3, shift3, bias3))
    assert y3.shape == (B3, F3)
    assert jnp.allclose(y3, _reference(x3, slope3, shift3, bias3), atol=1e-5, rtol=1e-5)

    # --- 4) bf16 I/O path (halves HBM traffic; compute stays f32 in-kernel).
    xb = x.astype(jnp.bfloat16)
    yb = jax.block_until_ready(sigmoid_forward(xb, slope, shift, bias))
    assert yb.dtype == jnp.bfloat16
    ref_b = _reference(xb.astype(jnp.float32), slope, shift, bias)
    assert jnp.allclose(yb.astype(jnp.float32), ref_b, atol=2e-2, rtol=2e-2)

    # TODO(synk): penalize() (L-p regularization of slope/shift) is a training-time
    # loss term, not part of the forward pass; left out of the kernel.
    print("KERNEL_OK")
</pallas_src>

<mosaic_0001>
module attributes {stable_mosaic.version = 11 : i64} {
  func.func @_sigmoid_kernel(%arg0: i32, %arg1: i32, %arg2: memref<1x256xf32, #tpu.memory_space<vmem>>, %arg3: memref<3x256xf32, #tpu.memory_space<vmem>>, %arg4: memref<1x256xf32, #tpu.memory_space<vmem>>) attributes {dimension_semantics = [#tpu.dimension_semantics<parallel>, #tpu.dimension_semantics<parallel>], iteration_bounds = array<i64: 1, 1>, scalar_prefetch = 0 : i64, scratch_operands = 0 : i64, tpu.core_type = #tpu.core_type<tc>, window_params = [{transform_indices = @transform_0, window_bounds = array<i64: 1, 256>}, {transform_indices = @transform_1, window_bounds = array<i64: 3, 256>}, {transform_indices = @transform_2, window_bounds = array<i64: 1, 256>}]} {
    %c0 = arith.constant 0 : index
    %c0_0 = arith.constant 0 : index
    %0 = vector.load %arg2[%c0, %c0_0] : memref<1x256xf32, #tpu.memory_space<vmem>>, vector<1x256xf32>
    %c0_1 = arith.constant 0 : index
    %c0_2 = arith.constant 0 : index
    %1 = vector.load %arg3[%c0_1, %c0_2] : memref<3x256xf32, #tpu.memory_space<vmem>>, vector<3x256xf32>
    %2 = vector.extract_strided_slice %1 {offsets = [0, 0], sizes = [1, 256], strides = [1, 1]} : vector<3x256xf32> to vector<1x256xf32>
    %3 = vector.extract_strided_slice %1 {offsets = [1, 0], sizes = [1, 256], strides = [1, 1]} : vector<3x256xf32> to vector<1x256xf32>
    %4 = vector.extract_strided_slice %1 {offsets = [2, 0], sizes = [1, 256], strides = [1, 1]} : vector<3x256xf32> to vector<1x256xf32>
    %5 = arith.mulf %2, %0 : vector<1x256xf32>
    %6 = arith.subf %5, %3 : vector<1x256xf32>
    %7 = math.tanh %6 : vector<1x256xf32>
    %cst = arith.constant 5.000000e-01 : f32
    %8 = vector.broadcast %cst : f32 to vector<1x256xf32>
    %9 = arith.mulf %8, %7 : vector<1x256xf32>
    %10 = arith.addf %9, %4 : vector<1x256xf32>
    %c0_3 = arith.constant 0 : index
    %c0_4 = arith.constant 0 : index
    %11 = vector.load %arg4[%c0_3, %c0_4] : memref<1x256xf32, #tpu.memory_space<vmem>>, vector<1x256xf32>
    tpu.vector_store %arg4[%c0_3, %c0_4], %10 {strides = array<i32>} : memref<1x256xf32, #tpu.memory_space<vmem>>, vector<1x256xf32>,
    return
  }
  func.func @transform_0(%arg0: i32, %arg1: i32) -> (i32, i32) {
    %c0_i32 = arith.constant 0 : i32
    return %arg0, %arg1 : i32, i32
  }
  func.func @transform_1(%arg0: i32, %arg1: i32) -> (i32, i32) {
    %c0_i32 = arith.constant 0 : i32
    %c0_i32_0 = arith.constant 0 : i32
    return %c0_i32, %arg1 : i32, i32
  }
  func.func @transform_2(%arg0: i32, %arg1: i32) -> (i32, i32) {
    %c0_i32 = arith.constant 0 : i32
    return %arg0, %arg1 : i32, i32
  }
}

</mosaic_0001>

<bundles_post_ra>
// kernel: tpu_custom_call.1
= control target key start
LH: loop header
LB: loop body
LE: loop exit
PB: predicated region body
PF: predicated region fallthrough
CT: control target
= control target key end

     0   :  { %7 = vsyncpa [#allocation3], 0  ;;  %s200_s0 = inlined_call_operand.hbm [shape: f32[1,256], index: 0, kind: input, shape index: {}]   ;;  %s201_s1 = inlined_call_operand.hbm [shape: f32[3,256], index: 1, kind: input, shape index: {}]   ;;  %s202_s2 = inlined_call_operand.hbm [shape: f32[1,256], index: 2, kind: output, shape index: {}]  }
   0x1   :  { %8 = vsyncpa [#allocation6], 0 }
   0x2   :  { %9 = vsyncpa [#allocation4], 0  ;;  %s171_s9 = smov [#allocation2]   ;;  %s172_s11 = smov [#allocation5]  }
   0x3   :  { %s16_s10 = sshll.u32 %s171_s9, 4  ;;  %s26_s12 = sshll.u32 %s172_s11, 4  ;;  %s17_s10 = int_to_ptr.vmem [resolvable:$true] %s16_s10  ;;  %s27_s12 = int_to_ptr.vmem [resolvable:$true] %s26_s12 }
   0x4   :  { %s113_s13 = scalar_lea.vmem %s17_s10, 32  ;;  %p118_p1 = scmp.lt.s32.totalorder %s17_s10, %s17_s10 }
   0x5   :  { %p114_p0 = scmp.ne.s32.totalorder %s17_s10, %s113_s13  ;;  %p119_p2 = scmp.lt.s32.totalorder %s113_s13, %s113_s13 }
   0x7   :  { %p120_p3 = por %p119_p2, %p118_p1 }
   0x9   :  { %p121_p4 = pnand %p120_p3, %p114_p0 }
   0xb   :  { %124 = shalt.err (!%p121_p4)
}
   0xc   :  { %19 = dma.hbm_to_vmem [thread:$0]  %s200_s0, 32, %s17_s10, [#allocation3]  }
   0xd   :  { %s133_s16 = scalar_lea.vmem %s27_s12, 128  ;;  %p138_p6 = scmp.lt.s32.totalorder %s27_s12, %s27_s12 }
   0xe   :  { %p134_p5 = scmp.ne.s32.totalorder %s27_s12, %s133_s16  ;;  %p139_p7 = scmp.lt.s32.totalorder %s133_s16, %s133_s16 }
  0x10   :  { %p140_p8 = por %p139_p7, %p138_p6 }
  0x12   :  { %p141_p9 = pnand %p140_p8, %p134_p5 }
  0x14   :  { %144 = shalt.err (!%p141_p9)
}
  0x15   :  { %29 = dma.hbm_to_vmem [thread:$0]  %s201_s1, 128, %s27_s12, [#allocation6]  }
  0x16   :  { %165 = dma.done.wait [#allocation3], 32  }
  0x17   :  { %166 = vsyncadd [#allocation3], 4294967264 }
  0x18   :  { %167 = dma.done.wait [#allocation6], 128  }
  0x19   :  { %168 = vsyncadd [#allocation6], 4294967168  ;;  %v42_v0 = vlaneseq  ;;  %v173_v1 = vmov 286326784   ;;  %v36_v6 = vld [vmem:[#allocation2] sm:$0x3]  ;;  %s175_s0 = smov [#allocation7]  }
  0x1a   :  { %v40_v2 = vunpack.c.l.s4 %v173_v1  ;;  %v37_v7 = vld [vmem:[#allocation5] sm:$0x77]  ;;  %v174_v12 = vmov 1966171168   ;;  %s86_s1 = sshll.u32 %s175_s0, 4  ;;  %s87_s1 = int_to_ptr.vmem [resolvable:$true] %s86_s1 }
  0x1b   :  { %v43_v3 = vshrl.u32 %v42_v0, 7  ;;  %v96_v9 = vrot.slane %v37_v7, 9  ;;  %v61_v13 = vunpack.c.l.s4 %v174_v12  ;;  %v97_v15 = vrot.slane %v37_v7, 10  ;;  %s145_s19 = scalar_lea.vmem %s87_s1, 32  ;;  %p150_p11 = scmp.lt.s32.totalorder %s87_s1, %s87_s1 }
  0x1c   :  { %v41_v4 = vunpack.c.0.s8 %v40_v2  ;;  %vm77_vm0 = vcmp.lt.s32.totalorder %v42_v0, 256  ;;  %p146_p10 = scmp.ne.s32.totalorder %s87_s1, %s145_s19  ;;  %p151_p12 = scmp.lt.s32.totalorder %s145_s19, %s145_s19 }
  0x1d   :  { %v62_v14 = vunpack.c.0.s8 %v61_v13 }
  0x1e   :  { %v44_v5 = vsub.s32 %v41_v4, %v43_v3  ;;  %p152_p13 = por %p151_p12, %p150_p11 }
  0x1f   :  { %v65_v18 = vsub.s32 %v62_v14, %v43_v3 }
  0x20   :  { %v45_v8 = vrot.slane %v36_v6, %v44_v5  ;;  %p153_p0 = pnand %p152_p13, %p146_p10 }
  0x22   :  { %v47_v10 = vmul.f32 %v45_v8, %v37_v7 }
  0x24   :  { %v52_v11 = vsub.f32 %v47_v10, %v96_v9 }
  0x26   :  { %103 = vtanh.f32 %v52_v11 }
  0x33   :  { %v104_v16 = vpop.eup %103 }
  0x34   :  { %v54_v17 = vmul.f32 0.5, %v104_v16 }
  0x36   :  { %v58_v19 = vadd.f32 %v97_v15, %v54_v17 }
  0x38   :  { %v66_v20 = vrot.slane %v58_v19, %v65_v18 }
  0x3a   :  { %v73_v21 = vrot.slane %v66_v20, %v65_v18 }
  0x3c   :  { %79 = vst.msk [vmem:[#allocation7] sm:$0x3] %vm77_vm0, %v73_v21 }
  0x3d   :  { %156 = shalt.err (!%p153_p0)
}
  0x3e   :  { %89 = dma.vmem_to_hbm [thread:$0]  %s87_s1, 32, %s202_s2, [#allocation4]  }
  0x3f   :  { %169 = dma.done.wait [#allocation4], 32  }
  0x40   :  { %170 = vsyncadd [#allocation4], 4294967264 }
  0x41   :  { %93 = vsyncpa [#allocation3], 1 }
  0x42   :  { %94 = vsyncpa [#allocation6], 1 }
  0x43   :  { %95 = vsyncpa [#allocation4], 1 }

</bundles_post_ra>
